<compile_context>
chip_gen: v5e
topology: v5e:2x2
jax: 0.10.0
libtpu: 0.0.40
codegen_flags: <defaults>
</compile_context>

<pallas_src>
import functools

import jax
import jax.numpy as jnp
from jax.experimental import pallas as pl
from jax.experimental.pallas import tpu as pltpu


def _elu_plus_one(t):
    # elu(t) + 1 == t + 1 for t > 0, exp(t) for t <= 0 (arg clamped for safety).
    return jnp.where(t > 0, t + 1.0, jnp.exp(jnp.minimum(t, 0.0)))


def linear_attention_kernel(x_ref, wq_ref, wk_ref, wv_ref, bqkv_ref,
                            wp_ref, bp_ref, mask_ref, o_ref):
    # x_ref    : (N, C)   current batch element (leading batch dim squeezed)
    # wq/wk/wv : (C, C)   pre-transposed ([in, out]) qkv weights
    # bqkv_ref : (3, C)   qkv bias rows (q, k, v), f32
    # wp_ref   : (C, C)   pre-transposed projection weight
    # bp_ref   : (1, C)   projection bias, f32
    # mask_ref : (C, C)   exact 0/1 block-diagonal head mask, f32
    # o_ref    : (N, C)
    x = x_ref[...]                      # native dtype (bf16 in prod, f32 here)
    dt = x.dtype
    b3 = bqkv_ref[...]                  # (3, C) f32
    mask = mask_ref[...]                # (C, C) f32

    # --- qkv projections: three lane-aligned MXU matmuls, f32 accumulate ----
    q_lin = jnp.dot(x, wq_ref[...], preferred_element_type=jnp.float32) + b3[0:1, :]
    k_lin = jnp.dot(x, wk_ref[...], preferred_element_type=jnp.float32) + b3[1:2, :]
    v = jnp.dot(x, wv_ref[...], preferred_element_type=jnp.float32) + b3[2:3, :]

    # Feature maps (elementwise, kept in f32).
    q = _elu_plus_one(q_lin)            # (N, C) f32
    k = _elu_plus_one(k_lin)            # (N, C) f32

    # --- linear-attention core, full C width + block-diagonal mask ----------
    # KV = blockdiag_h(K_h^T V_h): one full-width matmul, then zero the
    # off-diagonal DxD blocks with the exact 0/1 mask.
    kv = jax.lax.dot_general(
        k.astype(dt), v.astype(dt),
        dimension_numbers=(((0,), (0,)), ((), ())),
        preferred_element_type=jnp.float32)          # (C, C)
    kv = kv * mask

    # Per-head denominator expanded to channel width without any broadcast /
    # repeat shuffle: denom[n, e] = sum_{d in head(e)} q[n, d] * ksum[d]
    #              = ((q * ksum_row) @ mask)[n, e]            (kept in f32)
    ksum = jnp.sum(k, axis=0, keepdims=True)         # (1, C) f32
    denom = jnp.dot(q * ksum, mask, preferred_element_type=jnp.float32)  # (N, C)

    attn = jnp.dot(q.astype(dt), kv.astype(dt),
                   preferred_element_type=jnp.float32)        # (N, C)
    attn = attn * pl.reciprocal(denom, approx=True)           # EUP reciprocal

    # --- output projection + bias -------------------------------------------
    y = jnp.dot(attn.astype(dt), wp_ref[...],
                preferred_element_type=jnp.float32) + bp_ref[...]
    # Note: if production C >= 128 this store is lane-dense; for C < 128 it is
    # a masked partial store (tiny here).
    o_ref[...] = y.astype(o_ref.dtype)


@functools.partial(jax.jit, static_argnames=("num_heads",))
def linear_attention(x, w_qkv, b_qkv, w_proj, b_proj, *, num_heads):
    B, N, C = x.shape
    assert C % num_heads == 0
    D = C // num_heads
    dt = x.dtype
    itemsize = jnp.dtype(dt).itemsize

    # Pre-transpose / split the weights once outside the kernel (amortized
    # over the whole grid; keeps all in-kernel contractions lane-contiguous).
    w3 = w_qkv.reshape(3, C, C)
    wq_t = jnp.transpose(w3[0]).astype(dt)            # (C, C) [in, out]
    wk_t = jnp.transpose(w3[1]).astype(dt)
    wv_t = jnp.transpose(w3[2]).astype(dt)
    wp_t = jnp.transpose(w_proj).astype(dt)
    bqkv = b_qkv.reshape(3, C).astype(jnp.float32)
    bp = b_proj.reshape(1, C).astype(jnp.float32)

    # Exact 0/1 block-diagonal head mask (integer comparison -> exact zeros
    # off-diagonal, preserving per-head isolation bit-for-bit in f32).
    head_id = jnp.arange(C, dtype=jnp.int32) // D
    mask = (head_id[:, None] == head_id[None, :]).astype(jnp.float32)   # (C, C)

    # Explicit VMEM budget: double-buffered x/out blocks + resident weights +
    # f32 intermediates, clamped to [32 MiB, 64 MiB] so it is safe on
    # v5e/v6e/v7x scoped limits.
    est = 3 * (2 * (2 * N * C * itemsize)             # x + out blocks, 2 bufs
               + 5 * C * C * itemsize + C * C * 4     # weights + mask
               + 10 * N * C * 4 + 2 * C * C * 4)      # f32 intermediates
    vmem_limit = int(min(64 << 20, max(32 << 20, est)))

    return pl.pallas_call(
        linear_attention_kernel,
        out_shape=jax.ShapeDtypeStruct((B, N, C), x.dtype),
        grid=(B,),
        in_specs=[
            pl.BlockSpec((pl.Squeezed(), N, C), lambda b: (b, 0, 0)),  # x
            pl.BlockSpec((C, C), lambda b: (0, 0)),                    # wq_t
            pl.BlockSpec((C, C), lambda b: (0, 0)),                    # wk_t
            pl.BlockSpec((C, C), lambda b: (0, 0)),                    # wv_t
            pl.BlockSpec((3, C), lambda b: (0, 0)),                    # b_qkv
            pl.BlockSpec((C, C), lambda b: (0, 0)),                    # wproj_t
            pl.BlockSpec((1, C), lambda b: (0, 0)),                    # b_proj
            pl.BlockSpec((C, C), lambda b: (0, 0)),                    # head mask
        ],
        out_specs=pl.BlockSpec((pl.Squeezed(), N, C), lambda b: (b, 0, 0)),
        compiler_params=pltpu.CompilerParams(
            dimension_semantics=("parallel",),
            vmem_limit_bytes=vmem_limit,
        ),
    )(x, wq_t, wk_t, wv_t, bqkv, wp_t, bp, mask)


def linear_attention_reference(x, w_qkv, b_qkv, w_proj, b_proj, num_heads):
    """Pure-JAX reference mirroring the PyTorch LinearAttention.forward."""
    B, N, C = x.shape
    D = C // num_heads
    qkv = x @ w_qkv.T + b_qkv                                     # (B, N, 3C)
    qkv = qkv.reshape(B, N, 3, num_heads, D).transpose(2, 0, 3, 1, 4)
    q, k, v = qkv[0], qkv[1], qkv[2]                              # (B, H, N, D)
    q = jax.nn.elu(q) + 1.0
    k = jax.nn.elu(k) + 1.0
    kv = jnp.einsum("bhsd,bhse->bhde", k, v)
    z = 1.0 / jnp.einsum("bhsd,bhd->bhs", q, k.sum(axis=-2))
    out = jnp.einsum("bhde,bhsd,bhs->bhse", kv, q, z)
    out = out.transpose(0, 2, 1, 3).reshape(B, N, C)
    return out @ w_proj.T + b_proj


if __name__ == "__main__":
    B, N, C = 2, 16, 32
    num_heads = 8

    key = jax.random.PRNGKey(0)
    kx, kq, kqb, kp, kb = jax.random.split(key, 5)

    # Deterministic synthetic parameters (nn.Linear(dim, 3*dim, bias=True) /
    # nn.Linear(dim, dim) shapes, as used by MambaAttBlock with qkv_bias=True).
    x = jax.random.normal(kx, (B, N, C), dtype=jnp.float32)
    w_qkv = 0.1 * jax.random.normal(kq, (3 * C, C), dtype=jnp.float32)
    b_qkv = 0.1 * jax.random.normal(kqb, (3 * C,), dtype=jnp.float32)
    w_proj = 0.1 * jax.random.normal(kp, (C, C), dtype=jnp.float32)
    b_proj = 0.1 * jax.random.normal(kb, (C,), dtype=jnp.float32)

    out = linear_attention(x, w_qkv, b_qkv, w_proj, b_proj, num_heads=num_heads)
    out = jax.block_until_ready(out)

    ref = linear_attention_reference(x, w_qkv, b_qkv, w_proj, b_proj, num_heads)
    err = jnp.max(jnp.abs(out - ref))
    assert out.shape == (B, N, C)
    # Tolerance accounts for the EUP approximate reciprocal (approx=True).
    assert jnp.allclose(out, ref, atol=2e-3, rtol=2e-3), f"max abs err = {err}"
    print("KERNEL_OK")
</pallas_src>

<mosaic_0001>
module attributes {stable_mosaic.version = 11 : i64} {
  func.func @linear_attention_kernel(%arg0: i32, %arg1: memref<1x16x32xf32, #tpu.memory_space<vmem>>, %arg2: memref<32x32xf32, #tpu.memory_space<vmem>>, %arg3: memref<32x32xf32, #tpu.memory_space<vmem>>, %arg4: memref<32x32xf32, #tpu.memory_space<vmem>>, %arg5: memref<3x32xf32, #tpu.memory_space<vmem>>, %arg6: memref<32x32xf32, #tpu.memory_space<vmem>>, %arg7: memref<1x32xf32, #tpu.memory_space<vmem>>, %arg8: memref<32x32xf32, #tpu.memory_space<vmem>>, %arg9: memref<1x16x32xf32, #tpu.memory_space<vmem>>) attributes {dimension_semantics = [#tpu.dimension_semantics<parallel>], iteration_bounds = array<i64: 2>, scalar_prefetch = 0 : i64, scratch_operands = 0 : i64, tpu.core_type = #tpu.core_type<tc>, window_params = [{transform_indices = @transform_0, window_bounds = array<i64: 1, 16, 32>}, {pipeline_mode = #tpu.pipeline_mode<synchronous>, transform_indices = @transform_1, window_bounds = array<i64: 32, 32>}, {pipeline_mode = #tpu.pipeline_mode<synchronous>, transform_indices = @transform_2, window_bounds = array<i64: 32, 32>}, {pipeline_mode = #tpu.pipeline_mode<synchronous>, transform_indices = @transform_3, window_bounds = array<i64: 32, 32>}, {pipeline_mode = #tpu.pipeline_mode<synchronous>, transform_indices = @transform_4, window_bounds = array<i64: 3, 32>}, {pipeline_mode = #tpu.pipeline_mode<synchronous>, transform_indices = @transform_5, window_bounds = array<i64: 32, 32>}, {pipeline_mode = #tpu.pipeline_mode<synchronous>, transform_indices = @transform_6, window_bounds = array<i64: 1, 32>}, {pipeline_mode = #tpu.pipeline_mode<synchronous>, transform_indices = @transform_7, window_bounds = array<i64: 32, 32>}, {transform_indices = @transform_8, window_bounds = array<i64: 1, 16, 32>}]} {
    %c0 = arith.constant 0 : index
    %c0_0 = arith.constant 0 : index
    %c0_1 = arith.constant 0 : index
    %0 = vector.load %arg1[%c0, %c0_0, %c0_1] : memref<1x16x32xf32, #tpu.memory_space<vmem>>, vector<1x16x32xf32>
    %1 = vector.shape_cast %0 : vector<1x16x32xf32> to vector<16x32xf32>
    %c0_2 = arith.constant 0 : index
    %c0_3 = arith.constant 0 : index
    %2 = vector.load %arg5[%c0_2, %c0_3] : memref<3x32xf32, #tpu.memory_space<vmem>>, vector<3x32xf32>
    %c0_4 = arith.constant 0 : index
    %c0_5 = arith.constant 0 : index
    %3 = vector.load %arg8[%c0_4, %c0_5] : memref<32x32xf32, #tpu.memory_space<vmem>>, vector<32x32xf32>
    %c0_6 = arith.constant 0 : index
    %c0_7 = arith.constant 0 : index
    %4 = vector.load %arg2[%c0_6, %c0_7] : memref<32x32xf32, #tpu.memory_space<vmem>>, vector<32x32xf32>
    %cst = arith.constant dense<0.000000e+00> : vector<16x32xf32>
    %5 = tpu.matmul %1, %4, %cst {dimension_numbers = #tpu.dot_dimension_numbers<[1], [0], [0], [1], [0, 0, 1, 1], [], []>} : vector<16x32xf32>, vector<32x32xf32>, vector<16x32xf32> -> vector<16x32xf32>
    %6 = vector.extract_strided_slice %2 {offsets = [0, 0], sizes = [1, 32], strides = [1, 1]} : vector<3x32xf32> to vector<1x32xf32>
    %7 = vector.broadcast %6 : vector<1x32xf32> to vector<16x32xf32>
    %8 = arith.addf %5, %7 : vector<16x32xf32>
    %c0_8 = arith.constant 0 : index
    %c0_9 = arith.constant 0 : index
    %9 = vector.load %arg3[%c0_8, %c0_9] : memref<32x32xf32, #tpu.memory_space<vmem>>, vector<32x32xf32>
    %cst_10 = arith.constant dense<0.000000e+00> : vector<16x32xf32>
    %10 = tpu.matmul %1, %9, %cst_10 {dimension_numbers = #tpu.dot_dimension_numbers<[1], [0], [0], [1], [0, 0, 1, 1], [], []>} : vector<16x32xf32>, vector<32x32xf32>, vector<16x32xf32> -> vector<16x32xf32>
    %11 = vector.extract_strided_slice %2 {offsets = [1, 0], sizes = [1, 32], strides = [1, 1]} : vector<3x32xf32> to vector<1x32xf32>
    %12 = vector.broadcast %11 : vector<1x32xf32> to vector<16x32xf32>
    %13 = arith.addf %10, %12 : vector<16x32xf32>
    %c0_11 = arith.constant 0 : index
    %c0_12 = arith.constant 0 : index
    %14 = vector.load %arg4[%c0_11, %c0_12] : memref<32x32xf32, #tpu.memory_space<vmem>>, vector<32x32xf32>
    %cst_13 = arith.constant dense<0.000000e+00> : vector<16x32xf32>
    %15 = tpu.matmul %1, %14, %cst_13 {dimension_numbers = #tpu.dot_dimension_numbers<[1], [0], [0], [1], [0, 0, 1, 1], [], []>} : vector<16x32xf32>, vector<32x32xf32>, vector<16x32xf32> -> vector<16x32xf32>
    %16 = vector.extract_strided_slice %2 {offsets = [2, 0], sizes = [1, 32], strides = [1, 1]} : vector<3x32xf32> to vector<1x32xf32>
    %17 = vector.broadcast %16 : vector<1x32xf32> to vector<16x32xf32>
    %18 = arith.addf %15, %17 : vector<16x32xf32>
    %cst_14 = arith.constant 0.000000e+00 : f32
    %19 = vector.broadcast %cst_14 : f32 to vector<16x32xf32>
    %20 = arith.cmpf ogt, %8, %19 : vector<16x32xf32>
    %cst_15 = arith.constant 1.000000e+00 : f32
    %21 = vector.broadcast %cst_15 : f32 to vector<16x32xf32>
    %22 = arith.addf %8, %21 : vector<16x32xf32>
    %cst_16 = arith.constant 0.000000e+00 : f32
    %23 = vector.broadcast %cst_16 : f32 to vector<16x32xf32>
    %24 = arith.minimumf %8, %23 : vector<16x32xf32>
    %25 = math.exp %24 : vector<16x32xf32>
    %26 = arith.select %20, %22, %25 : vector<16x32xi1>, vector<16x32xf32>
    %cst_17 = arith.constant 0.000000e+00 : f32
    %27 = vector.broadcast %cst_17 : f32 to vector<16x32xf32>
    %28 = arith.cmpf ogt, %13, %27 : vector<16x32xf32>
    %cst_18 = arith.constant 1.000000e+00 : f32
    %29 = vector.broadcast %cst_18 : f32 to vector<16x32xf32>
    %30 = arith.addf %13, %29 : vector<16x32xf32>
    %cst_19 = arith.constant 0.000000e+00 : f32
    %31 = vector.broadcast %cst_19 : f32 to vector<16x32xf32>
    %32 = arith.minimumf %13, %31 : vector<16x32xf32>
    %33 = math.exp %32 : vector<16x32xf32>
    %34 = arith.select %28, %30, %33 : vector<16x32xi1>, vector<16x32xf32>
    %cst_20 = arith.constant dense<0.000000e+00> : vector<32x32xf32>
    %35 = tpu.matmul %34, %18, %cst_20 {dimension_numbers = #tpu.dot_dimension_numbers<[0], [0], [1], [1], [0, 1, 1, 1], [], []>} : vector<16x32xf32>, vector<16x32xf32>, vector<32x32xf32> -> vector<32x32xf32>
    %36 = arith.mulf %35, %3 : vector<32x32xf32>
    %cst_21 = arith.constant dense<0.000000e+00> : vector<32xf32>
    %37 = vector.multi_reduction <add>, %34, %cst_21 [0] : vector<16x32xf32> to vector<32xf32>
    %38 = vector.shape_cast %37 : vector<32xf32> to vector<1x32xf32>
    %39 = vector.broadcast %38 : vector<1x32xf32> to vector<16x32xf32>
    %40 = arith.mulf %26, %39 : vector<16x32xf32>
    %cst_22 = arith.constant dense<0.000000e+00> : vector<16x32xf32>
    %41 = tpu.matmul %40, %3, %cst_22 {dimension_numbers = #tpu.dot_dimension_numbers<[1], [0], [0], [1], [0, 0, 1, 1], [], []>} : vector<16x32xf32>, vector<32x32xf32>, vector<16x32xf32> -> vector<16x32xf32>
    %cst_23 = arith.constant dense<0.000000e+00> : vector<16x32xf32>
    %42 = tpu.matmul %26, %36, %cst_23 {dimension_numbers = #tpu.dot_dimension_numbers<[1], [0], [0], [1], [0, 0, 1, 1], [], []>} : vector<16x32xf32>, vector<32x32xf32>, vector<16x32xf32> -> vector<16x32xf32>
    %43 = tpu.reciprocal %41 {approx = true} : vector<16x32xf32> -> vector<16x32xf32>
    %44 = arith.mulf %42, %43 : vector<16x32xf32>
    %c0_24 = arith.constant 0 : index
    %c0_25 = arith.constant 0 : index
    %45 = vector.load %arg6[%c0_24, %c0_25] : memref<32x32xf32, #tpu.memory_space<vmem>>, vector<32x32xf32>
    %cst_26 = arith.constant dense<0.000000e+00> : vector<16x32xf32>
    %46 = tpu.matmul %44, %45, %cst_26 {dimension_numbers = #tpu.dot_dimension_numbers<[1], [0], [0], [1], [0, 0, 1, 1], [], []>} : vector<16x32xf32>, vector<32x32xf32>, vector<16x32xf32> -> vector<16x32xf32>
    %c0_27 = arith.constant 0 : index
    %c0_28 = arith.constant 0 : index
    %47 = vector.load %arg7[%c0_27, %c0_28] : memref<1x32xf32, #tpu.memory_space<vmem>>, vector<1x32xf32>
    %48 = vector.broadcast %47 : vector<1x32xf32> to vector<16x32xf32>
    %49 = arith.addf %46, %48 : vector<16x32xf32>
    %c0_29 = arith.constant 0 : index
    %c0_30 = arith.constant 0 : index
    %c0_31 = arith.constant 0 : index
    %50 = vector.load %arg9[%c0_29, %c0_30, %c0_31] : memref<1x16x32xf32, #tpu.memory_space<vmem>>, vector<1x16x32xf32>
    %51 = vector.shape_cast %50 : vector<1x16x32xf32> to vector<16x32xf32>
    %52 = vector.shape_cast %49 : vector<16x32xf32> to vector<1x16x32xf32>
    tpu.vector_store %arg9[%c0_29, %c0_30, %c0_31], %52 {strides = array<i32>} : memref<1x16x32xf32, #tpu.memory_space<vmem>>, vector<1x16x32xf32>,
    return
  }
  func.func @transform_0(%arg0: i32) -> (i32, i32, i32) {
    %c0_i32 = arith.constant 0 : i32
    %c0_i32_0 = arith.constant 0 : i32
    %c0_i32_1 = arith.constant 0 : i32
    return %arg0, %c0_i32, %c0_i32_0 : i32, i32, i32
  }
  func.func @transform_1(%arg0: i32) -> (i32, i32) {
    %c0_i32 = arith.constant 0 : i32
    %c0_i32_0 = arith.constant 0 : i32
    %c0_i32_1 = arith.constant 0 : i32
    return %c0_i32, %c0_i32_0 : i32, i32
  }
  func.func @transform_2(%arg0: i32) -> (i32, i32) {
    %c0_i32 = arith.constant 0 : i32
    %c0_i32_0 = arith.constant 0 : i32
    %c0_i32_1 = arith.constant 0 : i32
    return %c0_i32, %c0_i32_0 : i32, i32
  }
  func.func @transform_3(%arg0: i32) -> (i32, i32) {
    %c0_i32 = arith.constant 0 : i32
    %c0_i32_0 = arith.constant 0 : i32
    %c0_i32_1 = arith.constant 0 : i32
    return %c0_i32, %c0_i32_0 : i32, i32
  }
  func.func @transform_4(%arg0: i32) -> (i32, i32) {
    %c0_i32 = arith.constant 0 : i32
    %c0_i32_0 = arith.constant 0 : i32
    %c0_i32_1 = arith.constant 0 : i32
    return %c0_i32, %c0_i32_0 : i32, i32
  }
  func.func @transform_5(%arg0: i32) -> (i32, i32) {
    %c0_i32 = arith.constant 0 : i32
    %c0_i32_0 = arith.constant 0 : i32
    %c0_i32_1 = arith.constant 0 : i32
    return %c0_i32, %c0_i32_0 : i32, i32
  }
  func.func @transform_6(%arg0: i32) -> (i32, i32) {
    %c0_i32 = arith.constant 0 : i32
    %c0_i32_0 = arith.constant 0 : i32
    %c0_i32_1 = arith.constant 0 : i32
    return %c0_i32, %c0_i32_0 : i32, i32
  }
  func.func @transform_7(%arg0: i32) -> (i32, i32) {
    %c0_i32 = arith.constant 0 : i32
    %c0_i32_0 = arith.constant 0 : i32
    %c0_i32_1 = arith.constant 0 : i32
    return %c0_i32, %c0_i32_0 : i32, i32
  }
  func.func @transform_8(%arg0: i32) -> (i32, i32, i32) {
    %c0_i32 = arith.constant 0 : i32
    %c0_i32_0 = arith.constant 0 : i32
    %c0_i32_1 = arith.constant 0 : i32
    return %arg0, %c0_i32, %c0_i32_0 : i32, i32, i32
  }
}

</mosaic_0001>

<bundles_post_ra>
// kernel: linear_attention.1
= control target key start
LH: loop header
LB: loop body
LE: loop exit
PB: predicated region body
PF: predicated region fallthrough
CT: control target
= control target key end

     0   :  { %13 = vsyncpa [#allocation3], 0  ;;  %s1078_s0 = inlined_call_operand.vmem [shape: f32[2,16,32], index: 0, kind: input, shape index: {}]   ;;  %s1079_s1 = inlined_call_operand.vmem [shape: f32[32,32], index: 1, kind: input, shape index: {}]   ;;  %s1080_s2 = inlined_call_operand.vmem [shape: f32[32,32], index: 2, kind: input, shape index: {}]   ;;  %s1081_s3 = inlined_call_operand.vmem [shape: f32[32,32], index: 3, kind: input, shape index: {}]   ;;  %s1082_s4 = inlined_call_operand.vmem [shape: f32[3,32], index: 4, kind: input, shape index: {}]   ;;  %s1083_s5 = inlined_call_operand.vmem [shape: f32[32,32], index: 5, kind: input, shape index: {}]   ;;  %s1084_s6 = inlined_call_operand.vmem [shape: f32[1,32], index: 6, kind: input, shape index: {}]   ;;  %s1085_s7 = inlined_call_operand.vmem [shape: f32[32,32], index: 7, kind: input, shape index: {}]   ;;  %s1086_s8 = inlined_call_operand.hbm [shape: f32[2,16,32], index: 8, kind: output, shape index: {}]  }
   0x1   :  { %15 = vsyncpa [#allocation3 + $0x1], 0  ;;  %s890_s27 = smov 0   ;;  %s892_s28 = smov 0  }
   0x2   :  { %s894_s29 = smov 0   ;;  %s896_s30 = smov 0  }
   0x3 LB: > { %s911_s9 = sadd.s32 4294967295, %s841_s30   ;;  %s694_s10 = sadd.s32 4294967294, %s841_s30   ;;  %s841_s30 = sphi %s896_s30, %s1092_s30   ;;  %s837_s29 = sphi %s894_s29, %s1091_s29   ;;  %s833_s28 = sphi %s892_s28, %s1090_s28   ;;  %s829_s27 = sphi %s890_s27, %s1089_s27  }
   0x4   : > { %s915_s11 = sadd.s32 1, %s841_s30   ;;  %s201_s12 = sadd.s32 1, %s837_s29 }
   0x5   : > { %s198_s13 = ssub.s32 %s841_s30, %s915_s11  ;;  %p211_p0 = scmp.ne.s32.totalorder %s837_s29, %s833_s28 }
   0x6   : > { %p199_p1 = scmp.eq.s32.totalorder %s198_s13, 0  ;;  %p212_p2 = scmp.eq.s32.totalorder %s911_s9, 1 }
   0x7   : > { %p217_p3 = scmp.ne.s32.totalorder %s833_s28, %s829_s27  ;;  %p218_p4 = scmp.eq.s32.totalorder %s694_s10, 1 }
   0x8   : > { %s926_s14 = scalar_select %p199_p1, %s837_s29, %s201_s12  }
   0x9   : > { %p928_p5 = por %p212_p2, %p211_p0  ;;  %p932_p6 = por %p218_p4, %p217_p3 }
   0xa   : > { %p697_p7 = scmp.ge.s32.totalorder %s841_s30, 1  ;;  %p265_p8 = scmp.lt.s32.totalorder %s841_s30, 3 }
   0xc   : > { %p266_p9 = pnand %p697_p7, %p265_p8 }
   0xd   : > { %p299_p10 = scmp.lt.s32.totalorder (!%p266_p9), %s911_s9, 1  ;;  %s296_s25 = sand.u32 (!%p266_p9), 1, %s833_s28  }
   0xe   : > { %269 = sbr.rel (%p266_p9) target bundleno = 771 (0x303), region = 52  ;;  %s698_s26 = sshll.u32 (!%p266_p9), %s296_s25, 4 }
   0xf   : > { %s723_s13 = sshll.u32 (!%p266_p9), %s911_s9, 4  ;;  %s298_s20 = scalar_lea.vmem (!%p266_p9), [#allocation2], %s698_s26 }
  0x10   : > { %s629_s21 = sshll.u32 (!%p266_p9), %s298_s20, 4  ;;  %s617_s23 = scalar_lea.sflag (!%p266_p9), [#allocation3], %s296_s25  ;;  %s630_s21 = int_to_ptr.vmem [resolvable:$true] %s629_s21 }
  0x11   : > { %s799_s12 = scalar_lea.hbm (!%p266_p9), %s1086_s8, 32 }
  0x13   : > { %v349_v0 = vld [vmem:[%s1080_s2 + $0x18] sm:$0xff]  ;;  %v348_v1 = vld [vmem:[%s1080_s2 + $0x10] sm:$0xff]  ;;  %v347_v4 = vld [vmem:[%s1080_s2 + $0x8] sm:$0xff]  ;;  %s300_s10 = scalar_select %p299_p10, %s911_s9, 1  ;;  %vm316_vm0 = vcmask 261120   ;;  %vm458_vm5 = vcmask 130048  }
  0x14   : > { %363 = vmatpush.msra.mxu1 %v349_v0  ;;  %v314_v2 = vld [vmem:[%s1079_s1 + $0x18] sm:$0xff]  ;;  %v313_v3 = vld [vmem:[%s1079_s1 + $0x10] sm:$0xff]  ;;  %v312_v5 = vld [vmem:[%s1079_s1 + $0x8] sm:$0xff] }
  0x15   : > { %335 = vmatpush.msra.mxu0 %v314_v2  ;;  %v346_v6 = vld [vmem:[%s1080_s2] sm:$0xff]  ;;  %s722_s19 = sshll.u32 %s300_s10, 4  ;;  %v377_v10 = vld [vmem:[%s1081_s3 + $0x18] sm:$0xff]  ;;  %v376_v11 = vld [vmem:[%s1081_s3 + $0x10] sm:$0xff] }
  0x16   : > { %364 = vmatpush.msra.mxu1 %v348_v1  ;;  %s303_s22 = scalar_lea.vmem %s1078_s0, %s722_s19  ;;  %v311_v7 = vld [vmem:[%s1079_s1] sm:$0xff]  ;;  %391 = vmatpush.msra.mxu2 %v377_v10  ;;  %v375_v12 = vld [vmem:[%s1081_s3 + $0x8] sm:$0xff]  ;;  %v993_v17 = vld [vmem:[%s1085_s7 + $0x18] sm:$0xff]  ;;  %s628_s19 = scalar_lea.hbm %s1086_s8, %s723_s13 }
  0x17   : > { %336 = vmatpush.msra.mxu0 %v313_v3  ;;  %v304_v8 = vld [vmem:[%s303_s22] sm:$0xff]  ;;  %v305_v9 = vld [vmem:[%s303_s22 + $0x8] sm:$0xff]  ;;  %v1000_v19 = vld [vmem:[%s1085_s7 + $0x10] sm:$0xff]  ;;  %s631_s22 = sshll.u32 %s628_s19, 4  ;;  %s632_s22 = int_to_ptr.hbm [resolvable:$true] %s631_s22 }
  0x18   : > { %365 = vmatpush.msra.mxu1 %v347_v4  ;;  %392 = vmatpush.msra.mxu2 %v376_v11  ;;  %v374_v13 = vld [vmem:[%s1081_s3] sm:$0xff]  ;;  %v1006_v21 = vld [vmem:[%s1085_s7 + $0x8] sm:$0xff]  ;;  %s793_s9 = sshra.s32 %s632_s22, 4  ;;  %s794_s9 = int_to_ptr.hbm [resolvable:$true] %s793_s9 }
  0x19   : > { %337 = vmatpush.msra.mxu0 %v312_v5  ;;  %v987_v14 = vld [vmem:[%s1082_s4] sm:$0x7]  ;;  %s795_s24 = scalar_lea.hbm %s794_s9, 16  ;;  %p800_p0 = scmp.lt.s32.totalorder %s794_s9, %s1086_s8 }
  0x1a   : > { %366 = vmatpush.msra.mxu1 %v346_v6  ;;  %393 = vmatpush.msra.mxu2 %v375_v12  ;;  %v350_v15 = vperm.slane %v987_v14, 1  ;;  %v1011_v22 = vld [vmem:[%s1085_s7] sm:$0xff]  ;;  %v315_v27 = vperm.slane %v987_v14, 0  ;;  %v378_v61 = vperm.slane %v987_v14, 2  ;;  %p796_p11 = scmp.ne.s32.totalorder %s794_s9, %s795_s24  ;;  %p801_p1 = scmp.lt.s32.totalorder %s799_s12, %s795_s24 }
  0x1b   : > { %703 = vmatmul.msk.f32.vlgmr.msra.gmra.mxu1 %vm316_vm0, %v304_v8  ;;  %338 = vmatpush.msra.mxu0 %v311_v7  ;;  %v580_v7 = vld [vmem:[%s1083_s5 + $0x18] sm:$0xff] }
  0x1c   : > { %701 = vmatmul.msk.f32.vlgmr.msra.gmra.mxu0 %vm316_vm0, %v304_v8  ;;  %394 = vmatpush.msra.mxu2 %v374_v13  ;;  %p797_p12 = pnand %p796_p11, %p928_p5  ;;  %p802_p2 = por %p801_p1, %p800_p0 }
  0x1d   : > { %705 = vmatmul.msk.f32.vlgmr.msra.gmra.mxu2 %vm316_vm0, %v304_v8  ;;  %533 = vmatpush.msrb.mxu0 %v993_v17  ;;  %v579_v8 = vld [vmem:[%s1083_s5 + $0x10] sm:$0xff] }
  0x1e   : > { %603 = vmatpush.msrb.mxu2 %v580_v7  ;;  %p798_p13 = pneg %p797_p12 }
  0x1f   : > { %534 = vmatpush.msrb.mxu0 %v1000_v19 }
  0x20   : > { %604 = vmatpush.msrb.mxu2 %v579_v8  ;;  %p803_p3 = pnand %p802_p2, %p798_p13 }
  0x21   : > { %535 = vmatpush.msrb.mxu0 %v1006_v21 }
  0x23   : > { %704 = vmatmul.msk.f32.gmra.mxu1 %vm316_vm0, %v305_v9  ;;  %536 = vmatpush.msrb.mxu0 %v1011_v22 }
  0x24   : > { %702 = vmatmul.msk.f32.gmra.mxu0 %vm316_vm0, %v305_v9 }
  0x25   : > { %706 = vmatmul.msk.f32.gmra.mxu2 %vm316_vm0, %v305_v9 }
  0x98   : > { %v368_v16 = vpop.f32.mrf.mxu1 }
  0x99   : > { %v369_v18 = vadd.f32 %v368_v16, %v350_v15  ;;  %v340_v26 = vpop.f32.mrf.mxu0  ;;  %v577_v16 = vld [vmem:[%s1083_s5] sm:$0xff] }
  0x9a   : > { %v341_v33 = vadd.f32 %v340_v26, %v315_v27 }
  0x9b   : > { %v418_v20 = vmin.f32 %v369_v18, 0.0  ;;  %v416_v29 = vadd.f32 1.0, %v369_v18  ;;  %vm414_vm1 = vcmp.gt.f32.partialorder %v369_v18, 0.0 }
  0x9c   : > { %v406_v34 = vmin.f32 %v341_v33, 0.0  ;;  %v404_v49 = vadd.f32 1.0, %v341_v33  ;;  %vm402_vm3 = vcmp.gt.f32.partialorder %v341_v33, 0.0 }
  0x9d   : > { %v420_v23 = vmul.f32 1.442695, %v418_v20 }
  0x9e   : > { %v408_v38 = vmul.f32 1.442695, %v406_v34 }
  0x9f   : > { %767 = vpow2.f32 %v420_v23 }
  0xa0   : > { %v371_v24 = vpop.f32.mrf.mxu1  ;;  %v396_v60 = vpop.f32.mrf.mxu2 }
  0xa1   : > { %v372_v25 = vadd.f32 %v371_v24, %v350_v15  ;;  %v343_v35 = vpop.f32.mrf.mxu0  ;;  %v397_v63 = vadd.f32 %v396_v60, %v378_v61  ;;  %v578_v15 = vld [vmem:[%s1083_s5 + $0x8] sm:$0xff] }
  0xa2   : > { %v344_v40 = vadd.f32 %v343_v35, %v315_v27  ;;  %605 = vmatpush.msrb.mxu2 %v578_v15 }
  0xa3   : > { %v419_v28 = vmin.f32 %v372_v25, 0.0  ;;  %v417_v36 = vadd.f32 1.0, %v372_v25  ;;  %vm415_vm2 = vcmp.gt.f32.partialorder %v372_v25, 0.0  ;;  %v766_v25 = vld [vmem:[%s1084_s6] ss:$0 sm:$0xff] }
  0xa4   : > { %v407_v45 = vmin.f32 %v344_v40, 0.0  ;;  %v405_v56 = vadd.f32 1.0, %v344_v40  ;;  %vm403_vm4 = vcmp.gt.f32.partialorder %v344_v40, 0.0  ;;  %606 = vmatpush.msrb.mxu2 %v577_v16 }
  0xa5   : > { %v768_v30 = vpop.eup %767  ;;  %v422_v31 = vmul.f32 1.442695, %v419_v28 }
  0xa6   : > { %v424_v32 = vsel %vm414_vm1, %v416_v29, %v768_v30  ;;  %v410_v48 = vmul.f32 1.442695, %v407_v45 }
  0xa7   : > { %769 = vpow2.f32 %v422_v31  ;;  %426 = vxpose.xlu0.b32.start [1/2] (short) (narrow) %v424_v32, 32  ;;  %v504_v41 = vsel %vm316_vm0, %v424_v32, 0.0 }
  0xa8   : > { %771 = vpow2.f32 %v408_v38  ;;  %v399_v62 = vpop.f32.mrf.mxu2 }
  0xa9   : > { %773 = vpow2.f32 %v410_v48  ;;  %v400_v0 = vadd.f32 %v399_v62, %v378_v61 }
  0xab   : > { %485 = vmatpush.msra.mxu3 %v400_v0 }
  0xad   : > { %v770_v37 = vpop.eup %769  ;;  %486 = vmatpush.msra.mxu3 %v397_v63 }
  0xae   : > { %v425_v39 = vsel %vm415_vm2, %v417_v36, %v770_v37  ;;  %v772_v50 = vpop.eup %771 }
  0xaf   : > { %v505_v42 = vsel %vm316_vm0, %v425_v39, 0.0  ;;  %427 = vxpose.xlu0.b32.end [2/2] (short) (narrow) %v425_v39, 32  ;;  %v412_v53 = vsel %vm402_vm3, %v404_v49, %v772_v50  ;;  %v774_v57 = vpop.eup %773 }
  0xb0   : > { %v506_v43 = vadd.f32 %v505_v42, %v504_v41  ;;  %v413_v58 = vsel %vm403_vm4, %v405_v56, %v774_v57 }
  0xb2   : > { %v507_v44 = vrot.slane %v506_v43, 4 }
  0xb4   : > { %v508_v46 = vadd.f32 %v507_v44, %v506_v43 }
  0xb6   : > { %v509_v47 = vrot.slane %v508_v46, 2 }
  0xb8   : > { %v510_v51 = vadd.f32 %v509_v47, %v508_v46 }
  0xba   : > { %v511_v52 = vrot.slane %v510_v51, 1 }
  0xbc   : > { %v512_v54 = vadd.f32 %v511_v52, %v510_v51 }
  0xbe   : > { %v513_v55 = vmul.f32 %v512_v54, %v412_v53  ;;  %v514_v59 = vmul.f32 %v512_v54, %v413_v58 }
  0xc0   : > { %711 = vmatmul.msk.f32.vlgmr.msrb.gmra.mxu0 %vm316_vm0, %v513_v55 }
  0xc8   : > { %712 = vmatmul.msk.f32.gmra.mxu0 %vm316_vm0, %v514_v59 }
 0x14b   : > { %v442_v1 = vpop.trf.xlu0 }
 0x14c   : > { %707 = vmatmul.msk.f32.vlgmr.msra.gmra.mxu3 %vm458_vm5, %v442_v1 }
 0x153   : > { %v443_v2 = vpop.trf.xlu0 }
 0x154   : > { %708 = vmatmul.msk.f32.gmra.mxu3 %vm458_vm5, %v443_v2 }
 0x15b   : > { %v444_v3 = vpop.trf.xlu0 }
 0x15c   : > { %709 = vmatmul.msk.f32.gmra.mxu3 %vm458_vm5, %v444_v3 }
 0x163   : > { %v445_v4 = vpop.trf.xlu0 }
 0x164   : > { %710 = vmatmul.msk.f32.gmra.mxu3 %vm458_vm5, %v445_v4 }
 0x1cf   : > { %v488_v5 = vpop.f32.mrf.mxu3 }
 0x1d0   : > { %v500_v14 = vmul.f32 %v488_v5, %v1011_v22 }
 0x1d7   : > { %v491_v6 = vpop.f32.mrf.mxu3 }
 0x1d8   : > { %v501_v13 = vmul.f32 %v491_v6, %v1006_v21 }
 0x1df   : > { %v494_v9 = vpop.f32.mrf.mxu3 }
 0x1e0   : > { %v502_v12 = vmul.f32 %v494_v9, %v1000_v19 }
 0x1e7   : > { %v497_v10 = vpop.f32.mrf.mxu3 }
 0x1e8   : > { %v503_v11 = vmul.f32 %v497_v10, %v993_v17  ;;  %v538_v17 = vpop.f32.mrf.mxu0 }
 0x1e9   : > { %775 = vrcp.f32 %v538_v17 }
 0x1ea   : > { %562 = vmatpush.msrb.mxu1 %v503_v11 }
 0x1ec   : > { %563 = vmatpush.msrb.mxu1 %v502_v12 }
 0x1ee   : > { %564 = vmatpush.msrb.mxu1 %v501_v13 }
 0x1ef   : > { %v776_v19 = vpop.eup %775 }
 0x1f0   : > { %565 = vmatpush.msrb.mxu1 %v500_v14  ;;  %v541_v18 = vpop.f32.mrf.mxu0 }
 0x1f1   : > { %713 = vmatmul.msk.f32.vlgmr.msrb.gmra.mxu1 %vm316_vm0, %v412_v53  ;;  %777 = vrcp.f32 %v541_v18 }
 0x1f7   : > { %v778_v22 = vpop.eup %777 }
 0x1f9   : > { %714 = vmatmul.msk.f32.gmra.mxu1 %vm316_vm0, %v413_v58 }
 0x26e   : > { %v567_v20 = vpop.f32.mrf.mxu1 }
 0x26f   : > { %v575_v21 = vmul.f32 %v776_v19, %v567_v20 }
 0x271   : > { %715 = vmatmul.msk.f32.vlgmr.msrb.gmra.mxu2 %vm316_vm0, %v575_v21 }
 0x276   : > { %v570_v23 = vpop.f32.mrf.mxu1 }
 0x277   : > { %v576_v24 = vmul.f32 %v778_v22, %v570_v23 }
 0x279   : > { %716 = vmatmul.msk.f32.gmra.mxu2 %vm316_vm0, %v576_v24 }
 0x2f4   : > { %v608_v26 = vpop.f32.mrf.mxu2 }
 0x2f5   : > { %v609_v27 = vadd.f32 %v766_v25, %v608_v26 }
 0x2f7   : > { %614 = vst.msk [vmem:[%s298_s20] sm:$0xff] %vm316_vm0, %v609_v27 }
 0x2fc   : > { %v611_v28 = vpop.f32.mrf.mxu2 }
 0x2fd   : > { %v612_v29 = vadd.f32 %v766_v25, %v611_v28 }
 0x2ff   : > { %615 = vst.msk [vmem:[%s298_s20 + $0x8] sm:$0xff] %vm316_vm0, %v612_v29 }
 0x300   : > { %806 = shalt.err (!%p803_p3)
}
 0x301   : > { %s843_s25 = smov 128   ;;  %s844_s18 = smov 8  }
 0x302   : > { %724 = dma.vmem_to_hbm [thread:$0]  (%p928_p5), %s630_s21, 256, %s632_s22, %s617_s23, %s843_s25, %s843_s25, %s844_s18  }
 0x303 PF: > { %p730_p4 = scmp.ge.s32.totalorder %s841_s30, 2  ;;  %s646_s19 = sand.u32 1, %s829_s27  }
 0x304   : > { %s647_s20 = scalar_lea.sflag [#allocation3], %s646_s19 }
 0x305   : > { %p727_p7 = pnand %p730_p4, %p932_p6 }
 0x307   : > { %p728_p8 = pneg %p727_p7 }
 0x309   : > { %824 = dma.done.wait (%p728_p8), %s647_s20, 256  }
 0x30a   : > { %826 = vsyncadd (%p728_p8), %s647_s20, 4294967040  ;;  %p18_p9 = scmp.ge.s32.totalorder %s915_s11, 4   ;;  %s1089_s27 = smov %s833_s28 }
 0x30b   : > { %s1090_s28 = smov %s837_s29  ;;  %s1091_s29 = smov %s926_s14 }
 0x30c   : > { %s1092_s30 = smov %s915_s11  ;;  %20 = sbr.rel (!%p18_p9) target bundleno = 3 (0x3), region = 87 }
 0x311   :  { %653 = vsyncpa [#allocation3], 1 }
 0x312   :  { %655 = vsyncpa [#allocation3 + $0x1], 1 }

</bundles_post_ra>
